<compile_context>
chip_gen: v6e
topology: v6e:2x2x1
jax: 0.10.0
libtpu: 0.0.40
codegen_flags: <defaults>
</compile_context>

<pallas_src>
import jax
import jax.numpy as jnp
from jax.experimental import pallas as pl
from jax.experimental.pallas import tpu as pltpu


def _round_up(x, m):
    return ((x + m - 1) // m) * m


def _mapper_kernel(x_ref, w1_ref, b1_ref, w2_ref, b2_ref, o_ref, h1_ref):
    # Grid = (batch tiles [parallel], fc2 output-column tiles [arbitrary]).
    j = pl.program_id(1)

    # fc1 + LeakyReLU(0.2): compute once per batch tile (j == 0), reuse across j.
    @pl.when(j == 0)
    def _():
        h = jnp.dot(x_ref[...], w1_ref[...], preferred_element_type=jnp.float32)
        h = h + b1_ref[...]                           # (tb, ngh_pad) + (1, ngh_pad)
        h1 = jnp.where(h >= 0.0, h, 0.2 * h)          # LeakyReLU(0.2) in f32
        h1_ref[...] = h1.astype(h1_ref.dtype)

    # fc2 column tile j + ReLU (lane-dense padded output width).
    h2 = jnp.dot(h1_ref[...], w2_ref[...], preferred_element_type=jnp.float32)
    h2 = h2 + b2_ref[...]                             # (tb, tn) + (1, tn)
    o_ref[...] = jnp.maximum(h2, 0.0).astype(o_ref.dtype)


def mapper_forward(noise, att, alpha, w1, b1, w2, b2, *,
                   tile_b=1024, mxu_dtype=jnp.bfloat16):
    """noise: (B, nz); att: (B, attSize); w1: (nz+attSize, ngh); b1: (ngh,);
       w2: (ngh, resSize); b2: (resSize,).
       Returns (feature, reverse_feature), each (B, resSize)."""
    del alpha  # ReverseLayerF is identity in forward; alpha only scales the backward
    B, nz = noise.shape
    _, att_size = att.shape
    k = nz + att_size
    assert w1.shape[0] == k
    ngh = w1.shape[1]
    assert w2.shape[0] == ngh
    res_size = w2.shape[1]
    out_dtype = noise.dtype

    wbytes = jnp.dtype(mxu_dtype).itemsize
    obytes = jnp.dtype(out_dtype).itemsize

    # ---- padded, lane-dense problem sizes ----
    k_pad = _round_up(k, 128)
    ngh_pad = _round_up(ngh, 128)
    res_pad = _round_up(res_size, 128)

    # ---- fc2 column tile: keep each w2 tile a few MiB so v7x (64 MiB VMEM)
    # fits comfortably with double-buffering headroom ----
    max_tn = min(1024, max(128, ((6 << 20) // max(1, ngh_pad * wbytes)) // 128 * 128))
    if res_pad <= max_tn:
        tn = res_pad
    else:
        tn = 128
        for cand in range(max_tn, 127, -128):
            if res_pad % cand == 0:
                tn = cand
                break
    num_n = res_pad // tn

    # ---- VMEM budget, derived from hardware when possible ----
    try:
        vmem_cap = int(pltpu.get_tpu_info().vmem_capacity_bytes)
    except Exception:
        vmem_cap = 64 << 20  # conservative: v7x per-TensorCore VMEM
    vmem_cap = max(vmem_cap, 32 << 20)
    cap = (vmem_cap * 3) // 4  # ~48 MiB on v7x, ~96 MiB on v5e/v6e

    def vmem_need(tb):  # conservative (double-buffered) estimate
        return int(2 * tb * k_pad * wbytes                              # x stream
                   + 2 * (k_pad * ngh_pad * wbytes + 8 * ngh_pad * 4)   # w1, b1
                   + 2 * (ngh_pad * tn * wbytes + 8 * tn * 4)           # w2, b2 tiles
                   + 2 * tb * tn * obytes                               # out stream
                   + tb * ngh_pad * wbytes                              # h1 scratch
                   + (4 << 20))                                         # headroom

    # ---- batch tile: sublane-aligned, fits VMEM, >=2 grid steps for v7x megacore ----
    tile_b = _round_up(max(8, min(int(tile_b), B)), 8)
    while tile_b > 8 and vmem_need(tile_b) > cap:
        tile_b = _round_up(tile_b // 2, 8)
    while tile_b > 8 and _round_up(B, tile_b) // tile_b < 2:
        tile_b = _round_up(tile_b // 2, 8)
    b_pad = _round_up(B, tile_b)
    num_b = b_pad // tile_b

    vmem_limit = int(min(cap, max(32 << 20, 2 * vmem_need(tile_b))))

    # ---- host-side prep: fuse cat(noise, att) into one lane-dense MXU input ----
    x = jnp.concatenate([noise, att], axis=1).astype(mxu_dtype)
    x = jnp.pad(x, ((0, b_pad - B), (0, k_pad - k)))
    w1p = jnp.pad(w1.astype(mxu_dtype), ((0, k_pad - k), (0, ngh_pad - ngh)))
    w2p = jnp.pad(w2.astype(mxu_dtype), ((0, ngh_pad - ngh), (0, res_pad - res_size)))
    b1p = jnp.pad(b1.astype(jnp.float32), (0, ngh_pad - ngh)).reshape(1, ngh_pad)
    b2p = jnp.pad(b2.astype(jnp.float32), (0, res_pad - res_size)).reshape(1, res_pad)

    cost = pl.CostEstimate(
        flops=2 * b_pad * (k_pad * ngh_pad + ngh_pad * res_pad),
        transcendentals=0,
        bytes_accessed=(b_pad * k_pad * wbytes
                        + k_pad * ngh_pad * wbytes + ngh_pad * 4
                        + ngh_pad * res_pad * wbytes + res_pad * 4
                        + b_pad * res_pad * obytes),
    )

    def call(single_buffer_weights):
        def resident(shape, index_map):
            # Constant index_map -> one buffer is enough; halves resident VMEM.
            if single_buffer_weights:
                return pl.BlockSpec(shape, index_map, pipeline_mode=pl.Buffered(1))
            return pl.BlockSpec(shape, index_map)

        # w2/b2 are resident only when there is a single column tile.
        col_spec = resident if num_n == 1 else pl.BlockSpec

        grid_spec = pltpu.PrefetchScalarGridSpec(
            num_scalar_prefetch=0,
            grid=(num_b, num_n),
            in_specs=[
                pl.BlockSpec((tile_b, k_pad), lambda i, j: (i, 0)),   # x = [noise|att]
                resident((k_pad, ngh_pad), lambda i, j: (0, 0)),      # w1 (resident)
                resident((1, ngh_pad), lambda i, j: (0, 0)),          # b1 (resident)
                col_spec((ngh_pad, tn), lambda i, j: (0, j)),         # w2 column tile
                col_spec((1, tn), lambda i, j: (0, j)),               # b2 column tile
            ],
            out_specs=pl.BlockSpec((tile_b, tn), lambda i, j: (i, j)),
            scratch_shapes=[pltpu.VMEM((tile_b, ngh_pad), mxu_dtype)],  # h1 reuse
        )
        return pl.pallas_call(
            _mapper_kernel,
            out_shape=jax.ShapeDtypeStruct((b_pad, res_pad), out_dtype),
            grid_spec=grid_spec,
            compiler_params=pltpu.CompilerParams(
                dimension_semantics=("parallel", "arbitrary"),
                vmem_limit_bytes=vmem_limit,
            ),
            cost_estimate=cost,
        )(x, w1p, b1p, w2p, b2p)

    try:
        out_pad = call(True)
    except Exception:
        # Fallback for jax versions without BlockSpec(pipeline_mode=pl.Buffered(1)):
        # default double-buffered resident weights (same math).
        out_pad = call(False)

    if b_pad != B or res_pad != res_size:
        feature = out_pad[:B, :res_size]
    else:
        feature = out_pad
    # TODO(synk): ReverseLayerF is a gradient-reversal autograd op; forward is the
    # identity (alpha only negates/scales the backward), so reverse_feature shares
    # feature's values here. Training through this needs a jax.custom_vjp wrapper.
    reverse_feature = feature
    return feature, reverse_feature


if __name__ == "__main__":
    # Small synthetic shapes consistent with Mapper(opt):
    #   opt.attSize = 64, opt.nz = 32, opt.ngh = 128, opt.resSize = 256, batch = 8
    B, att_size, nz, ngh, res_size = 8, 64, 32, 128, 256

    key = jax.random.PRNGKey(0)
    kn, ka, kw1, kb1, kw2, kb2 = jax.random.split(key, 6)

    noise = jax.random.normal(kn, (B, nz), dtype=jnp.float32)
    att = jax.random.normal(ka, (B, att_size), dtype=jnp.float32)
    alpha = 0.5

    # Deterministic parameter init (uniform, PyTorch-Linear-like scale).
    lim1 = 1.0 / ((att_size + nz) ** 0.5)
    lim2 = 1.0 / (ngh ** 0.5)
    w1 = jax.random.uniform(kw1, (nz + att_size, ngh), jnp.float32, -lim1, lim1)
    b1 = jax.random.uniform(kb1, (ngh,), jnp.float32, -lim1, lim1)
    w2 = jax.random.uniform(kw2, (ngh, res_size), jnp.float32, -lim2, lim2)
    b2 = jax.random.uniform(kb2, (res_size,), jnp.float32, -lim2, lim2)

    # Pure-JAX f32 reference.
    h = jnp.concatenate([noise, att], axis=1)
    ref_h1 = jax.nn.leaky_relu(h @ w1 + b1, negative_slope=0.2)
    ref = jnp.maximum(ref_h1 @ w2 + b2, 0.0)

    # f32 MXU path: tight-tolerance correctness check.
    f32_feat, f32_rev = mapper_forward(noise, att, alpha, w1, b1, w2, b2,
                                       mxu_dtype=jnp.float32)
    f32_feat = jax.block_until_ready(f32_feat)
    assert f32_feat.shape == (B, res_size)
    assert jnp.allclose(f32_feat, ref, atol=1e-5, rtol=1e-5)
    assert jnp.allclose(f32_rev, ref, atol=1e-5, rtol=1e-5)

    # Default bf16-weight path (v6e/v7x MXU peak): bf16-appropriate tolerance.
    feature, reverse_feature = mapper_forward(noise, att, alpha, w1, b1, w2, b2)
    feature = jax.block_until_ready(feature)
    reverse_feature = jax.block_until_ready(reverse_feature)
    assert feature.shape == (B, res_size)
    assert reverse_feature.shape == (B, res_size)
    assert jnp.allclose(feature, ref, atol=5e-2, rtol=5e-2)
    assert jnp.allclose(reverse_feature, ref, atol=5e-2, rtol=5e-2)

    print("KERNEL_OK")
</pallas_src>

<mosaic_0001>
module attributes {stable_mosaic.version = 11 : i64} {
  func.func @_mapper_kernel(%arg0: i32, %arg1: i32, %arg2: memref<8x128xf32, #tpu.memory_space<vmem>>, %arg3: memref<128x128xf32, #tpu.memory_space<vmem>>, %arg4: memref<1x128xf32, #tpu.memory_space<vmem>>, %arg5: memref<128x256xf32, #tpu.memory_space<vmem>>, %arg6: memref<1x256xf32, #tpu.memory_space<vmem>>, %arg7: memref<8x256xf32, #tpu.memory_space<vmem>>, %arg8: memref<8x128xf32, #tpu.memory_space<vmem>>) attributes {dimension_semantics = [#tpu.dimension_semantics<parallel>, #tpu.dimension_semantics<arbitrary>], iteration_bounds = array<i64: 1, 1>, scalar_prefetch = 0 : i64, scratch_operands = 1 : i64, tpu.core_type = #tpu.core_type<tc>, window_params = [{transform_indices = @transform_0, window_bounds = array<i64: 8, 128>}, {pipeline_mode = #tpu.pipeline_mode<synchronous>, transform_indices = @transform_1, window_bounds = array<i64: 128, 128>}, {pipeline_mode = #tpu.pipeline_mode<synchronous>, transform_indices = @transform_2, window_bounds = array<i64: 1, 128>}, {pipeline_mode = #tpu.pipeline_mode<synchronous>, transform_indices = @transform_3, window_bounds = array<i64: 128, 256>}, {pipeline_mode = #tpu.pipeline_mode<synchronous>, transform_indices = @transform_4, window_bounds = array<i64: 1, 256>}, {transform_indices = @transform_5, window_bounds = array<i64: 8, 256>}]} {
    %c0_i32 = arith.constant 0 : i32
    %0 = arith.cmpi eq, %arg1, %c0_i32 : i32
    %1 = arith.extui %0 : i1 to i32
    %c0_i32_0 = arith.constant 0 : i32
    %2 = arith.cmpi ne, %1, %c0_i32_0 : i32
    scf.if %2 {
      %c0_9 = arith.constant 0 : index
      %c0_10 = arith.constant 0 : index
      %12 = vector.load %arg2[%c0_9, %c0_10] : memref<8x128xf32, #tpu.memory_space<vmem>>, vector<8x128xf32>
      %c0_11 = arith.constant 0 : index
      %c0_12 = arith.constant 0 : index
      %13 = vector.load %arg3[%c0_11, %c0_12] : memref<128x128xf32, #tpu.memory_space<vmem>>, vector<128x128xf32>
      %cst_13 = arith.constant dense<0.000000e+00> : vector<8x128xf32>
      %14 = tpu.matmul %12, %13, %cst_13 {dimension_numbers = #tpu.dot_dimension_numbers<[1], [0], [0], [1], [0, 0, 1, 1], [], []>} : vector<8x128xf32>, vector<128x128xf32>, vector<8x128xf32> -> vector<8x128xf32>
      %c0_14 = arith.constant 0 : index
      %c0_15 = arith.constant 0 : index
      %15 = vector.load %arg4[%c0_14, %c0_15] : memref<1x128xf32, #tpu.memory_space<vmem>>, vector<1x128xf32>
      %16 = vector.broadcast %15 : vector<1x128xf32> to vector<8x128xf32>
      %17 = arith.addf %14, %16 : vector<8x128xf32>
      %cst_16 = arith.constant 0.000000e+00 : f32
      %18 = vector.broadcast %cst_16 : f32 to vector<8x128xf32>
      %19 = arith.cmpf oge, %17, %18 : vector<8x128xf32>
      %cst_17 = arith.constant 2.000000e-01 : f32
      %20 = vector.broadcast %cst_17 : f32 to vector<8x128xf32>
      %21 = arith.mulf %20, %17 : vector<8x128xf32>
      %22 = arith.select %19, %17, %21 : vector<8x128xi1>, vector<8x128xf32>
      %c0_18 = arith.constant 0 : index
      %c0_19 = arith.constant 0 : index
      %23 = vector.load %arg8[%c0_18, %c0_19] : memref<8x128xf32, #tpu.memory_space<vmem>>, vector<8x128xf32>
      tpu.vector_store %arg8[%c0_18, %c0_19], %22 {strides = array<i32>} : memref<8x128xf32, #tpu.memory_space<vmem>>, vector<8x128xf32>,
    } else {
    }
    %c0 = arith.constant 0 : index
    %c0_1 = arith.constant 0 : index
    %3 = vector.load %arg8[%c0, %c0_1] : memref<8x128xf32, #tpu.memory_space<vmem>>, vector<8x128xf32>
    %c0_2 = arith.constant 0 : index
    %c0_3 = arith.constant 0 : index
    %4 = vector.load %arg5[%c0_2, %c0_3] : memref<128x256xf32, #tpu.memory_space<vmem>>, vector<128x256xf32>
    %cst = arith.constant dense<0.000000e+00> : vector<8x256xf32>
    %5 = tpu.matmul %3, %4, %cst {dimension_numbers = #tpu.dot_dimension_numbers<[1], [0], [0], [1], [0, 0, 1, 1], [], []>} : vector<8x128xf32>, vector<128x256xf32>, vector<8x256xf32> -> vector<8x256xf32>
    %c0_4 = arith.constant 0 : index
    %c0_5 = arith.constant 0 : index
    %6 = vector.load %arg6[%c0_4, %c0_5] : memref<1x256xf32, #tpu.memory_space<vmem>>, vector<1x256xf32>
    %7 = vector.broadcast %6 : vector<1x256xf32> to vector<8x256xf32>
    %8 = arith.addf %5, %7 : vector<8x256xf32>
    %cst_6 = arith.constant 0.000000e+00 : f32
    %9 = vector.broadcast %cst_6 : f32 to vector<8x256xf32>
    %10 = arith.maximumf %8, %9 : vector<8x256xf32>
    %c0_7 = arith.constant 0 : index
    %c0_8 = arith.constant 0 : index
    %11 = vector.load %arg7[%c0_7, %c0_8] : memref<8x256xf32, #tpu.memory_space<vmem>>, vector<8x256xf32>
    tpu.vector_store %arg7[%c0_7, %c0_8], %10 {strides = array<i32>} : memref<8x256xf32, #tpu.memory_space<vmem>>, vector<8x256xf32>,
    return
  }
  func.func @transform_0(%arg0: i32, %arg1: i32) -> (i32, i32) {
    %c0_i32 = arith.constant 0 : i32
    %c0_i32_0 = arith.constant 0 : i32
    return %arg0, %c0_i32 : i32, i32
  }
  func.func @transform_1(%arg0: i32, %arg1: i32) -> (i32, i32) {
    %c0_i32 = arith.constant 0 : i32
    %c0_i32_0 = arith.constant 0 : i32
    %c0_i32_1 = arith.constant 0 : i32
    return %c0_i32, %c0_i32_0 : i32, i32
  }
  func.func @transform_2(%arg0: i32, %arg1: i32) -> (i32, i32) {
    %c0_i32 = arith.constant 0 : i32
    %c0_i32_0 = arith.constant 0 : i32
    %c0_i32_1 = arith.constant 0 : i32
    return %c0_i32, %c0_i32_0 : i32, i32
  }
  func.func @transform_3(%arg0: i32, %arg1: i32) -> (i32, i32) {
    %c0_i32 = arith.constant 0 : i32
    %c0_i32_0 = arith.constant 0 : i32
    return %c0_i32, %arg1 : i32, i32
  }
  func.func @transform_4(%arg0: i32, %arg1: i32) -> (i32, i32) {
    %c0_i32 = arith.constant 0 : i32
    %c0_i32_0 = arith.constant 0 : i32
    return %c0_i32, %arg1 : i32, i32
  }
  func.func @transform_5(%arg0: i32, %arg1: i32) -> (i32, i32) {
    %c0_i32 = arith.constant 0 : i32
    return %arg0, %arg1 : i32, i32
  }
}

module attributes {stable_mosaic.version = 11 : i64} {
  func.func @_mapper_kernel(%arg0: i32, %arg1: i32, %arg2: memref<8x128xf32, #tpu.memory_space<vmem>>, %arg3: memref<128x128xf32, #tpu.memory_space<vmem>>, %arg4: memref<1x128xf32, #tpu.memory_space<vmem>>, %arg5: memref<128x256xf32, #tpu.memory_space<vmem>>, %arg6: memref<1x256xf32, #tpu.memory_space<vmem>>, %arg7: memref<8x256xf32, #tpu.memory_space<vmem>>, %arg8: memref<8x128xf32, #tpu.memory_space<vmem>>) attributes {dimension_semantics = [#tpu.dimension_semantics<parallel>, #tpu.dimension_semantics<arbitrary>], iteration_bounds = array<i64: 1, 1>, scalar_prefetch = 0 : i64, scratch_operands = 1 : i64, tpu.core_type = #tpu.core_type<tc>, window_params = [{transform_indices = @transform_0, window_bounds = array<i64: 8, 128>}, {pipeline_mode = #tpu.pipeline_mode<synchronous>, transform_indices = @transform_1, window_bounds = array<i64: 128, 128>}, {pipeline_mode = #tpu.pipeline_mode<synchronous>, transform_indices = @transform_2, window_bounds = array<i64: 1, 128>}, {transform_indices = @transform_3, window_bounds = array<i64: 128, 256>}, {transform_indices = @transform_4, window_bounds = array<i64: 1, 256>}, {transform_indices = @transform_5, window_bounds = array<i64: 8, 256>}]} {
    %c0_i32 = arith.constant 0 : i32
    %0 = arith.cmpi eq, %arg1, %c0_i32 : i32
    %1 = arith.extui %0 : i1 to i32
    %c0_i32_0 = arith.constant 0 : i32
    %2 = arith.cmpi ne, %1, %c0_i32_0 : i32
    scf.if %2 {
      %c0_9 = arith.constant 0 : index
      %c0_10 = arith.constant 0 : index
      %12 = vector.load %arg2[%c0_9, %c0_10] : memref<8x128xf32, #tpu.memory_space<vmem>>, vector<8x128xf32>
      %c0_11 = arith.constant 0 : index
      %c0_12 = arith.constant 0 : index
      %13 = vector.load %arg3[%c0_11, %c0_12] : memref<128x128xf32, #tpu.memory_space<vmem>>, vector<128x128xf32>
      %cst_13 = arith.constant dense<0.000000e+00> : vector<8x128xf32>
      %14 = tpu.matmul %12, %13, %cst_13 {dimension_numbers = #tpu.dot_dimension_numbers<[1], [0], [0], [1], [0, 0, 1, 1], [], []>} : vector<8x128xf32>, vector<128x128xf32>, vector<8x128xf32> -> vector<8x128xf32>
      %c0_14 = arith.constant 0 : index
      %c0_15 = arith.constant 0 : index
      %15 = vector.load %arg4[%c0_14, %c0_15] : memref<1x128xf32, #tpu.memory_space<vmem>>, vector<1x128xf32>
      %16 = vector.broadcast %15 : vector<1x128xf32> to vector<8x128xf32>
      %17 = arith.addf %14, %16 : vector<8x128xf32>
      %cst_16 = arith.constant 0.000000e+00 : f32
      %18 = vector.broadcast %cst_16 : f32 to vector<8x128xf32>
      %19 = arith.cmpf oge, %17, %18 : vector<8x128xf32>
      %cst_17 = arith.constant 2.000000e-01 : f32
      %20 = vector.broadcast %cst_17 : f32 to vector<8x128xf32>
      %21 = arith.mulf %20, %17 : vector<8x128xf32>
      %22 = arith.select %19, %17, %21 : vector<8x128xi1>, vector<8x128xf32>
      %c0_18 = arith.constant 0 : index
      %c0_19 = arith.constant 0 : index
      %23 = vector.load %arg8[%c0_18, %c0_19] : memref<8x128xf32, #tpu.memory_space<vmem>>, vector<8x128xf32>
      tpu.vector_store %arg8[%c0_18, %c0_19], %22 {strides = array<i32>} : memref<8x128xf32, #tpu.memory_space<vmem>>, vector<8x128xf32>,
    } else {
    }
    %c0 = arith.constant 0 : index
    %c0_1 = arith.constant 0 : index
    %3 = vector.load %arg8[%c0, %c0_1] : memref<8x128xf32, #tpu.memory_space<vmem>>, vector<8x128xf32>
    %c0_2 = arith.constant 0 : index
    %c0_3 = arith.constant 0 : index
    %4 = vector.load %arg5[%c0_2, %c0_3] : memref<128x256xf32, #tpu.memory_space<vmem>>, vector<128x256xf32>
    %cst = arith.constant dense<0.000000e+00> : vector<8x256xf32>
    %5 = tpu.matmul %3, %4, %cst {dimension_numbers = #tpu.dot_dimension_numbers<[1], [0], [0], [1], [0, 0, 1, 1], [], []>} : vector<8x128xf32>, vector<128x256xf32>, vector<8x256xf32> -> vector<8x256xf32>
    %c0_4 = arith.constant 0 : index
    %c0_5 = arith.constant 0 : index
    %6 = vector.load %arg6[%c0_4, %c0_5] : memref<1x256xf32, #tpu.memory_space<vmem>>, vector<1x256xf32>
    %7 = vector.broadcast %6 : vector<1x256xf32> to vector<8x256xf32>
    %8 = arith.addf %5, %7 : vector<8x256xf32>
    %cst_6 = arith.constant 0.000000e+00 : f32
    %9 = vector.broadcast %cst_6 : f32 to vector<8x256xf32>
    %10 = arith.maximumf %8, %9 : vector<8x256xf32>
    %c0_7 = arith.constant 0 : index
    %c0_8 = arith.constant 0 : index
    %11 = vector.load %arg7[%c0_7, %c0_8] : memref<8x256xf32, #tpu.memory_space<vmem>>, vector<8x256xf32>
    tpu.vector_store %arg7[%c0_7, %c0_8], %10 {strides = array<i32>} : memref<8x256xf32, #tpu.memory_space<vmem>>, vector<8x256xf32>,
    return
  }
  func.func @transform_0(%arg0: i32, %arg1: i32) -> (i32, i32) {
    %c0_i32 = arith.constant 0 : i32
    %c0_i32_0 = arith.constant 0 : i32
    return %arg0, %c0_i32 : i32, i32
  }
  func.func @transform_1(%arg0: i32, %arg1: i32) -> (i32, i32) {
    %c0_i32 = arith.constant 0 : i32
    %c0_i32_0 = arith.constant 0 : i32
    %c0_i32_1 = arith.constant 0 : i32
    return %c0_i32, %c0_i32_0 : i32, i32
  }
  func.func @transform_2(%arg0: i32, %arg1: i32) -> (i32, i32) {
    %c0_i32 = arith.constant 0 : i32
    %c0_i32_0 = arith.constant 0 : i32
    %c0_i32_1 = arith.constant 0 : i32
    return %c0_i32, %c0_i32_0 : i32, i32
  }
  func.func @transform_3(%arg0: i32, %arg1: i32) -> (i32, i32) {
    %c0_i32 = arith.constant 0 : i32
    %c0_i32_0 = arith.constant 0 : i32
    return %c0_i32, %arg1 : i32, i32
  }
  func.func @transform_4(%arg0: i32, %arg1: i32) -> (i32, i32) {
    %c0_i32 = arith.constant 0 : i32
    %c0_i32_0 = arith.constant 0 : i32
    return %c0_i32, %arg1 : i32, i32
  }
  func.func @transform_5(%arg0: i32, %arg1: i32) -> (i32, i32) {
    %c0_i32 = arith.constant 0 : i32
    return %arg0, %arg1 : i32, i32
  }
}

</mosaic_0001>

<bundles_post_ra>
// kernel: tpu_custom_call.1
= control target key start
LH: loop header
LB: loop body
LE: loop exit
PB: predicated region body
PF: predicated region fallthrough
CT: control target
= control target key end

     0   :  { %10 = vsyncpa [#allocation4], 0  ;;  %s523_s0 = inlined_call_operand.hbm [shape: f32[8,128], index: 0, kind: input, shape index: {}]   ;;  %s524_s1 = inlined_call_operand.hbm [shape: f32[128,128], index: 1, kind: input, shape index: {}]   ;;  %s525_s2 = inlined_call_operand.vmem [shape: f32[1,128], index: 2, kind: input, shape index: {}]   ;;  %s526_s3 = inlined_call_operand.hbm [shape: f32[128,256], index: 3, kind: input, shape index: {}]   ;;  %s527_s4 = inlined_call_operand.vmem [shape: f32[1,256], index: 4, kind: input, shape index: {}]   ;;  %s528_s5 = inlined_call_operand.hbm [shape: f32[8,256], index: 5, kind: output, shape index: {}]  }
   0x1   :  { %11 = vsyncpa [#allocation7], 0 }
   0x2   :  { %12 = vsyncpa [#allocation5], 0  ;;  %s447_s18 = smov [#allocation6]  }
   0x3   :  { %s28_s19 = sshll.u32 %s447_s18, 4  ;;  %s29_s19 = int_to_ptr.vmem [resolvable:$true] %s28_s19 }
   0x4   :  { %s369_s20 = scalar_lea.vmem %s29_s19, 2048  ;;  %p374_p1 = scmp.lt.s32.totalorder %s29_s19, %s29_s19 }
   0x5   :  { %p370_p0 = scmp.ne.s32.totalorder %s29_s19, %s369_s20  ;;  %p375_p2 = scmp.lt.s32.totalorder %s369_s20, %s369_s20 }
   0x7   :  { %p376_p3 = por %p375_p2, %p374_p1 }
   0x9   :  { %p377_p4 = pnand %p376_p3, %p370_p0 }
   0xb   :  { %380 = shalt.err (!%p377_p4)
}
   0xc   :  { %s448_s21 = smov 128   ;;  %s449_s22 = smov 8  }
   0xd   :  { %34 = dma.hbm_to_vmem [thread:$0]  %s524_s1, 2048, %s29_s19, [#allocation7], %s448_s21, %s448_s21, %s449_s22  }
   0xe   :  { %s450_s25 = smov [#allocation3]   ;;  %s451_s27 = smov [#allocation8]  }
   0xf   :  { %s19_s26 = sshll.u32 %s450_s25, 4  ;;  %s42_s28 = sshll.u32 %s451_s27, 4  ;;  %s20_s26 = int_to_ptr.vmem [resolvable:$true] %s19_s26  ;;  %s43_s28 = int_to_ptr.vmem [resolvable:$true] %s42_s28 }
  0x10   :  { %s389_s29 = scalar_lea.vmem %s20_s26, 128  ;;  %p394_p6 = scmp.lt.s32.totalorder %s20_s26, %s20_s26 }
  0x11   :  { %p390_p5 = scmp.ne.s32.totalorder %s20_s26, %s389_s29  ;;  %p395_p7 = scmp.lt.s32.totalorder %s389_s29, %s389_s29 }
  0x13   :  { %p396_p8 = por %p395_p7, %p394_p6 }
  0x15   :  { %p397_p9 = pnand %p396_p8, %p390_p5 }
  0x17   :  { %400 = shalt.err (!%p397_p9)
}
  0x18   :  { %22 = dma.hbm_to_vmem [thread:$0]  %s523_s0, 128, %s20_s26, [#allocation4]  }
  0x19   :  { %s409_s7 = scalar_lea.vmem %s43_s28, 4096  ;;  %p414_p11 = scmp.lt.s32.totalorder %s43_s28, %s43_s28 }
  0x1a   :  { %p410_p10 = scmp.ne.s32.totalorder %s43_s28, %s409_s7  ;;  %p415_p12 = scmp.lt.s32.totalorder %s409_s7, %s409_s7 }
  0x1c   :  { %p416_p13 = por %p415_p12, %p414_p11 }
  0x1e   :  { %p417_p0 = pnand %p416_p13, %p410_p10 }
  0x20   :  { %420 = shalt.err (!%p417_p0)
}
  0x21   :  { %s452_s1 = smov 256   ;;  %s453_s8 = smov 16  }
  0x22   :  { %48 = dma.hbm_to_vmem [thread:$0]  %s526_s3, 4096, %s43_s28, [#allocation7], %s452_s1, %s452_s1, %s453_s8  }
  0x23   :  { %441 = dma.done.wait [#allocation4], 128  }
  0x24   :  { %442 = vsyncadd [#allocation4], 4294967168 }
  0x25   :  { %443 = dma.done.wait [#allocation7], 6144  }
  0x26   :  { %444 = vsyncadd [#allocation7], 4294961152  ;;  %v454_v0 = vmov 0.0   ;;  %vm455_vm0 = vmmov 0   ;;  %v80_v1 = vld [vmem:[#allocation6 + $0x78] sm:$0xff]  ;;  %v79_v2 = vld [vmem:[#allocation6 + $0x70] sm:$0xff]  ;;  %v197_v56 = vlaneseq }
  0x27   :  { %316 = vmatprep.subr.mxu0 %v454_v0  ;;  %348 = vmatprep.mubr.msk.f32.mxu0 %vm455_vm0, %v454_v0  ;;  %v78_v3 = vld [vmem:[#allocation6 + $0x68] sm:$0xff]  ;;  %v77_v4 = vld [vmem:[#allocation6 + $0x60] sm:$0xff]  ;;  %v76_v5 = vld [vmem:[#allocation6 + $0x58] sm:$0xff] }
  0x28   :  { %271 = vmatprep.mubr.f32.mxu1 %v454_v0  ;;  %317 = vmatpush3.msra.mxu0 %v80_v1  ;;  %v194_v6 = vld [vmem:[#allocation8 + $0xf8] sm:$0xff]  ;;  %v193_v7 = vld [vmem:[#allocation8 + $0xf0] sm:$0xff]  ;;  %v192_v8 = vld [vmem:[#allocation8 + $0xe8] sm:$0xff]  ;;  %v198_v57 = vshrl.u32 %v197_v56, 7 }
  0x29   :  { %318 = vmatprep.subr.mxu0 %v454_v0  ;;  %207 = vmatprep.subr.mxu1 %v194_v6  ;;  %v191_v9 = vld [vmem:[#allocation8 + $0xe0] sm:$0xff]  ;;  %v190_v10 = vld [vmem:[#allocation8 + $0xd8] sm:$0xff]  ;;  %v75_v11 = vld [vmem:[#allocation6 + $0x50] sm:$0xff] }
  0x2a   :  { %319 = vmatpush3.msra.mxu0 %v79_v2  ;;  %208 = vmatpush1.msra.mxu1 %v193_v7  ;;  %v189_v12 = vld [vmem:[#allocation8 + $0xd0] sm:$0xff]  ;;  %v188_v13 = vld [vmem:[#allocation8 + $0xc8] sm:$0xff]  ;;  %v187_v15 = vld [vmem:[#allocation8 + $0xc0] sm:$0xff]  ;;  %v199_v58 = vsub.s32 0, %v198_v57  ;;  %v203_v60 = vsub.s32 1, %v198_v57 }
  0x2b   :  { %320 = vmatprep.subr.mxu0 %v454_v0  ;;  %209 = vmatprep.subr.mxu1 %v192_v8  ;;  %v74_v14 = vld [vmem:[#allocation6 + $0x48] sm:$0xff]  ;;  %v186_v16 = vld [vmem:[#allocation8 + $0xb8] sm:$0xff]  ;;  %v73_v17 = vld [vmem:[#allocation6 + $0x40] sm:$0xff] }
  0x2c   :  { %321 = vmatpush3.msra.mxu0 %v78_v3  ;;  %210 = vmatpush1.msra.mxu1 %v191_v9  ;;  %v185_v18 = vld [vmem:[#allocation8 + $0xb0] sm:$0xff]  ;;  %v184_v19 = vld [vmem:[#allocation8 + $0xa8] sm:$0xff]  ;;  %v72_v20 = vld [vmem:[#allocation6 + $0x38] sm:$0xff] }
  0x2d   :  { %322 = vmatprep.subr.mxu0 %v454_v0  ;;  %211 = vmatprep.subr.mxu1 %v190_v10  ;;  %v183_v21 = vld [vmem:[#allocation8 + $0xa0] sm:$0xff]  ;;  %v182_v22 = vld [vmem:[#allocation8 + $0x98] sm:$0xff]  ;;  %v71_v23 = vld [vmem:[#allocation6 + $0x30] sm:$0xff] }
  0x2e   :  { %323 = vmatpush3.msra.mxu0 %v77_v4  ;;  %212 = vmatpush1.msra.mxu1 %v189_v12  ;;  %v181_v24 = vld [vmem:[#allocation8 + $0x90] sm:$0xff]  ;;  %v180_v25 = vld [vmem:[#allocation8 + $0x88] sm:$0xff]  ;;  %v179_v27 = vld [vmem:[#allocation8 + $0x80] sm:$0xff] }
  0x2f   :  { %324 = vmatprep.subr.mxu0 %v454_v0  ;;  %213 = vmatprep.subr.mxu1 %v188_v13  ;;  %v70_v26 = vld [vmem:[#allocation6 + $0x28] sm:$0xff]  ;;  %v178_v28 = vld [vmem:[#allocation8 + $0x78] sm:$0xff]  ;;  %v69_v29 = vld [vmem:[#allocation6 + $0x20] sm:$0xff] }
  0x30   :  { %325 = vmatpush3.msra.mxu0 %v76_v5  ;;  %214 = vmatpush1.msra.mxu1 %v187_v15  ;;  %v177_v30 = vld [vmem:[#allocation8 + $0x70] sm:$0xff]  ;;  %v176_v31 = vld [vmem:[#allocation8 + $0x68] sm:$0xff]  ;;  %v68_v32 = vld [vmem:[#allocation6 + $0x18] sm:$0xff] }
  0x31   :  { %326 = vmatprep.subr.mxu0 %v454_v0  ;;  %215 = vmatprep.subr.mxu1 %v186_v16  ;;  %v175_v33 = vld [vmem:[#allocation8 + $0x60] sm:$0xff]  ;;  %v174_v34 = vld [vmem:[#allocation8 + $0x58] sm:$0xff]  ;;  %v67_v35 = vld [vmem:[#allocation6 + $0x10] sm:$0xff] }
  0x32   :  { %327 = vmatpush3.msra.mxu0 %v75_v11  ;;  %216 = vmatpush1.msra.mxu1 %v185_v18  ;;  %v173_v36 = vld [vmem:[#allocation8 + $0x50] sm:$0xff]  ;;  %v172_v37 = vld [vmem:[#allocation8 + $0x48] sm:$0xff]  ;;  %v171_v39 = vld [vmem:[#allocation8 + $0x40] sm:$0xff] }
  0x33   :  { %328 = vmatprep.subr.mxu0 %v454_v0  ;;  %217 = vmatprep.subr.mxu1 %v184_v19  ;;  %v66_v38 = vld [vmem:[#allocation6 + $0x8] sm:$0xff]  ;;  %v170_v40 = vld [vmem:[#allocation8 + $0x38] sm:$0xff]  ;;  %v65_v41 = vld [vmem:[#allocation6] sm:$0xff] }
  0x34   :  { %329 = vmatpush3.msra.mxu0 %v74_v14  ;;  %218 = vmatpush1.msra.mxu1 %v183_v21  ;;  %v169_v42 = vld [vmem:[#allocation8 + $0x30] sm:$0xff]  ;;  %v64_v43 = vld [vmem:[#allocation3] sm:$0xff]  ;;  %v168_v44 = vld [vmem:[#allocation8 + $0x28] sm:$0xff] }
  0x35   :  { %330 = vmatprep.subr.mxu0 %v454_v0  ;;  %219 = vmatprep.subr.mxu1 %v182_v22  ;;  %v167_v45 = vld [vmem:[#allocation8 + $0x20] sm:$0xff]  ;;  %v166_v46 = vld [vmem:[#allocation8 + $0x18] sm:$0xff]  ;;  %v165_v47 = vld [vmem:[#allocation8 + $0x10] sm:$0xff] }
  0x36   :  { %331 = vmatpush3.msra.mxu0 %v73_v17  ;;  %220 = vmatpush1.msra.mxu1 %v181_v24  ;;  %v164_v48 = vld [vmem:[#allocation8 + $0x8] sm:$0xff]  ;;  %v163_v49 = vld [vmem:[#allocation8] sm:$0xff]  ;;  %v298_v50 = vld [vmem:[%s525_s2] ss:$0 sm:$0xff]  ;;  %s456_s2 = smov [#allocation9]  }
  0x37   :  { %332 = vmatprep.subr.mxu0 %v454_v0  ;;  %221 = vmatprep.subr.mxu1 %v180_v25  ;;  %v195_v59 = vld [vmem:[%s527_s4] sm:$0x3]  ;;  %s288_s13 = sshll.u32 %s456_s2, 4  ;;  %s289_s13 = int_to_ptr.vmem [resolvable:$true] %s288_s13 }
  0x38   :  { %333 = vmatpush3.msra.mxu0 %v72_v20  ;;  %222 = vmatpush1.msra.mxu1 %v179_v27  ;;  %v200_v61 = vrot.slane %v195_v59, %v199_v58  ;;  %v204_v62 = vrot.slane %v195_v59, %v203_v60  ;;  %s421_s14 = scalar_lea.vmem %s289_s13, 256  ;;  %p426_p2 = scmp.lt.s32.totalorder %s289_s13, %s289_s13 }
  0x39   :  { %334 = vmatprep.subr.mxu0 %v454_v0  ;;  %223 = vmatprep.subr.mxu1 %v178_v28  ;;  %p422_p1 = scmp.ne.s32.totalorder %s289_s13, %s421_s14  ;;  %p427_p3 = scmp.lt.s32.totalorder %s421_s14, %s421_s14 }
  0x3a   :  { %335 = vmatpush3.msra.mxu0 %v71_v23  ;;  %224 = vmatpush1.msra.mxu1 %v177_v30 }
  0x3b   :  { %336 = vmatprep.subr.mxu0 %v454_v0  ;;  %225 = vmatprep.subr.mxu1 %v176_v31  ;;  %p428_p4 = por %p427_p3, %p426_p2 }
  0x3c   :  { %337 = vmatpush3.msra.mxu0 %v70_v26  ;;  %226 = vmatpush1.msra.mxu1 %v175_v33 }
  0x3d   :  { %338 = vmatprep.subr.mxu0 %v454_v0  ;;  %227 = vmatprep.subr.mxu1 %v174_v34  ;;  %p429_p5 = pnand %p428_p4, %p422_p1 }
  0x3e   :  { %339 = vmatpush3.msra.mxu0 %v69_v29  ;;  %228 = vmatpush1.msra.mxu1 %v173_v36 }
  0x3f   :  { %340 = vmatprep.subr.mxu0 %v454_v0  ;;  %229 = vmatprep.subr.mxu1 %v172_v37 }
  0x40   :  { %341 = vmatpush3.msra.mxu0 %v68_v32  ;;  %230 = vmatpush1.msra.mxu1 %v171_v39 }
  0x41   :  { %342 = vmatprep.subr.mxu0 %v454_v0  ;;  %231 = vmatprep.subr.mxu1 %v170_v40 }
  0x42   :  { %343 = vmatpush3.msra.mxu0 %v67_v35  ;;  %232 = vmatpush1.msra.mxu1 %v169_v42 }
  0x43   :  { %344 = vmatprep.subr.mxu0 %v454_v0  ;;  %233 = vmatprep.subr.mxu1 %v168_v44 }
  0x44   :  { %345 = vmatpush3.msra.mxu0 %v66_v38  ;;  %234 = vmatpush1.msra.mxu1 %v167_v45 }
  0x45   :  { %346 = vmatprep.subr.mxu0 %v454_v0  ;;  %235 = vmatprep.subr.mxu1 %v166_v46 }
  0x46   :  { %347 = vmatpush3.msra.mxu0 %v65_v41  ;;  %236 = vmatpush1.msra.mxu1 %v165_v47 }
  0x47   :  { %349 = vmatmul.mubr.f32.vlgmr.msra.gmra.mxu0 %v64_v43  ;;  %237 = vmatprep.subr.mxu1 %v164_v48 }
  0x48   :  { %238 = vmatpush1.msra.mxu1 %v163_v49 }
 0x107   :  { %v154_v51 = vpop.f32.mrf.mxu0 }
 0x108   :  { %v155_v52 = vadd.f32 %v298_v50, %v154_v51 }
 0x109   :  { %v350_v53 = vpop.f32.mrf.mxu0 }
 0x10a   :  { %v159_v54 = vmul.f32 0.2, %v155_v52  ;;  %vm158_vm1 = vcmp.ge.f32.partialorder %v155_v52, 0.0 }
 0x10c   :  { %v160_v55 = vsel %vm158_vm1, %v155_v52, %v159_v54 }
 0x10d   :  { %272 = vmatmul.mubr.f32.vlgmr.msra.gmra.mxu1 %v160_v55 }
 0x1cd   :  { %v273_v63 = vpop.f32.mrf.mxu1 }
 0x1ce   :  { %v274_v0 = vadd.f32 %v273_v63, %v200_v61 }
 0x1cf   :  { %v275_v1 = vpop.f32.mrf.mxu1 }
 0x1d0   :  { %v278_v2 = vmax.f32 %v274_v0, 0.0  ;;  %v276_v3 = vadd.f32 %v275_v1, %v204_v62 }
 0x1d2   :  { %280 = vst [vmem:[#allocation9] sm:$0xff] %v278_v2  ;;  %v279_v4 = vmax.f32 %v276_v3, 0.0 }
 0x1d4   :  { %281 = vst [vmem:[#allocation9 + $0x8] sm:$0xff] %v279_v4 }
 0x1d5   :  { %432 = shalt.err (!%p429_p5)
}
 0x1d6   :  { %291 = dma.vmem_to_hbm [thread:$0]  %s289_s13, 256, %s528_s5, [#allocation5]  }
 0x1d7   :  { %445 = dma.done.wait [#allocation5], 256  }
 0x1d8   :  { %446 = vsyncadd [#allocation5], 4294967040 }
 0x1d9   :  { %295 = vsyncpa [#allocation4], 1 }
 0x1da   :  { %296 = vsyncpa [#allocation7], 1 }
 0x1db   :  { %297 = vsyncpa [#allocation5], 1 }

// kernel: tpu_custom_call.1
= control target key start
LH: loop header
LB: loop body
LE: loop exit
PB: predicated region body
PF: predicated region fallthrough
CT: control target
= control target key end

     0   :  { %10 = vsyncpa [#allocation4], 0  ;;  %s523_s0 = inlined_call_operand.hbm [shape: f32[8,128], index: 0, kind: input, shape index: {}]   ;;  %s524_s1 = inlined_call_operand.hbm [shape: f32[128,128], index: 1, kind: input, shape index: {}]   ;;  %s525_s2 = inlined_call_operand.vmem [shape: f32[1,128], index: 2, kind: input, shape index: {}]   ;;  %s526_s3 = inlined_call_operand.hbm [shape: f32[128,256], index: 3, kind: input, shape index: {}]   ;;  %s527_s4 = inlined_call_operand.vmem [shape: f32[1,256], index: 4, kind: input, shape index: {}]   ;;  %s528_s5 = inlined_call_operand.hbm [shape: f32[8,256], index: 5, kind: output, shape index: {}]  }
   0x1   :  { %11 = vsyncpa [#allocation7], 0 }
   0x2   :  { %12 = vsyncpa [#allocation5], 0  ;;  %s447_s18 = smov [#allocation6]  }
   0x3   :  { %s28_s19 = sshll.u32 %s447_s18, 4  ;;  %s29_s19 = int_to_ptr.vmem [resolvable:$true] %s28_s19 }
   0x4   :  { %s369_s20 = scalar_lea.vmem %s29_s19, 2048  ;;  %p374_p1 = scmp.lt.s32.totalorder %s29_s19, %s29_s19 }
   0x5   :  { %p370_p0 = scmp.ne.s32.totalorder %s29_s19, %s369_s20  ;;  %p375_p2 = scmp.lt.s32.totalorder %s369_s20, %s369_s20 }
   0x7   :  { %p376_p3 = por %p375_p2, %p374_p1 }
   0x9   :  { %p377_p4 = pnand %p376_p3, %p370_p0 }
   0xb   :  { %380 = shalt.err (!%p377_p4)
}
   0xc   :  { %s448_s21 = smov 128   ;;  %s449_s22 = smov 8  }
   0xd   :  { %34 = dma.hbm_to_vmem [thread:$0]  %s524_s1, 2048, %s29_s19, [#allocation7], %s448_s21, %s448_s21, %s449_s22  }
   0xe   :  { %s450_s25 = smov [#allocation3]   ;;  %s451_s27 = smov [#allocation8]  }
   0xf   :  { %s19_s26 = sshll.u32 %s450_s25, 4  ;;  %s42_s28 = sshll.u32 %s451_s27, 4  ;;  %s20_s26 = int_to_ptr.vmem [resolvable:$true] %s19_s26  ;;  %s43_s28 = int_to_ptr.vmem [resolvable:$true] %s42_s28 }
  0x10   :  { %s389_s29 = scalar_lea.vmem %s20_s26, 128  ;;  %p394_p6 = scmp.lt.s32.totalorder %s20_s26, %s20_s26 }
  0x11   :  { %p390_p5 = scmp.ne.s32.totalorder %s20_s26, %s389_s29  ;;  %p395_p7 = scmp.lt.s32.totalorder %s389_s29, %s389_s29 }
  0x13   :  { %p396_p8 = por %p395_p7, %p394_p6 }
  0x15   :  { %p397_p9 = pnand %p396_p8, %p390_p5 }
  0x17   :  { %400 = shalt.err (!%p397_p9)
}
  0x18   :  { %22 = dma.hbm_to_vmem [thread:$0]  %s523_s0, 128, %s20_s26, [#allocation4]  }
  0x19   :  { %s409_s7 = scalar_lea.vmem %s43_s28, 4096  ;;  %p414_p11 = scmp.lt.s32.totalorder %s43_s28, %s43_s28 }
  0x1a   :  { %p410_p10 = scmp.ne.s32.totalorder %s43_s28, %s409_s7  ;;  %p415_p12 = scmp.lt.s32.totalorder %s409_s7, %s409_s7 }
  0x1c   :  { %p416_p13 = por %p415_p12, %p414_p11 }
  0x1e   :  { %p417_p0 = pnand %p416_p13, %p410_p10 }
  0x20   :  { %420 = shalt.err (!%p417_p0)
}
  0x21   :  { %s452_s1 = smov 256   ;;  %s453_s8 = smov 16  }
  0x22   :  { %48 = dma.hbm_to_vmem [thread:$0]  %s526_s3, 4096, %s43_s28, [#allocation7], %s452_s1, %s452_s1, %s453_s8  }
  0x23   :  { %441 = dma.done.wait [#allocation4], 128  }
  0x24   :  { %442 = vsyncadd [#allocation4], 4294967168 }
  0x25   :  { %443 = dma.done.wait [#allocation7], 6144  }
  0x26   :  { %444 = vsyncadd [#allocation7], 4294961152  ;;  %v454_v0 = vmov 0.0   ;;  %vm455_vm0 = vmmov 0   ;;  %v80_v1 = vld [vmem:[#allocation6 + $0x78] sm:$0xff]  ;;  %v79_v2 = vld [vmem:[#allocation6 + $0x70] sm:$0xff]  ;;  %v197_v56 = vlaneseq }
  0x27   :  { %316 = vmatprep.subr.mxu0 %v454_v0  ;;  %348 = vmatprep.mubr.msk.f32.mxu0 %vm455_vm0, %v454_v0  ;;  %v78_v3 = vld [vmem:[#allocation6 + $0x68] sm:$0xff]  ;;  %v77_v4 = vld [vmem:[#allocation6 + $0x60] sm:$0xff]  ;;  %v76_v5 = vld [vmem:[#allocation6 + $0x58] sm:$0xff] }
  0x28   :  { %271 = vmatprep.mubr.f32.mxu1 %v454_v0  ;;  %317 = vmatpush3.msra.mxu0 %v80_v1  ;;  %v194_v6 = vld [vmem:[#allocation8 + $0xf8] sm:$0xff]  ;;  %v193_v7 = vld [vmem:[#allocation8 + $0xf0] sm:$0xff]  ;;  %v192_v8 = vld [vmem:[#allocation8 + $0xe8] sm:$0xff]  ;;  %v198_v57 = vshrl.u32 %v197_v56, 7 }
  0x29   :  { %318 = vmatprep.subr.mxu0 %v454_v0  ;;  %207 = vmatprep.subr.mxu1 %v194_v6  ;;  %v191_v9 = vld [vmem:[#allocation8 + $0xe0] sm:$0xff]  ;;  %v190_v10 = vld [vmem:[#allocation8 + $0xd8] sm:$0xff]  ;;  %v75_v11 = vld [vmem:[#allocation6 + $0x50] sm:$0xff] }
  0x2a   :  { %319 = vmatpush3.msra.mxu0 %v79_v2  ;;  %208 = vmatpush1.msra.mxu1 %v193_v7  ;;  %v189_v12 = vld [vmem:[#allocation8 + $0xd0] sm:$0xff]  ;;  %v188_v13 = vld [vmem:[#allocation8 + $0xc8] sm:$0xff]  ;;  %v187_v15 = vld [vmem:[#allocation8 + $0xc0] sm:$0xff]  ;;  %v199_v58 = vsub.s32 0, %v198_v57  ;;  %v203_v60 = vsub.s32 1, %v198_v57 }
  0x2b   :  { %320 = vmatprep.subr.mxu0 %v454_v0  ;;  %209 = vmatprep.subr.mxu1 %v192_v8  ;;  %v74_v14 = vld [vmem:[#allocation6 + $0x48] sm:$0xff]  ;;  %v186_v16 = vld [vmem:[#allocation8 + $0xb8] sm:$0xff]  ;;  %v73_v17 = vld [vmem:[#allocation6 + $0x40] sm:$0xff] }
  0x2c   :  { %321 = vmatpush3.msra.mxu0 %v78_v3  ;;  %210 = vmatpush1.msra.mxu1 %v191_v9  ;;  %v185_v18 = vld [vmem:[#allocation8 + $0xb0] sm:$0xff]  ;;  %v184_v19 = vld [vmem:[#allocation8 + $0xa8] sm:$0xff]  ;;  %v72_v20 = vld [vmem:[#allocation6 + $0x38] sm:$0xff] }
  0x2d   :  { %322 = vmatprep.subr.mxu0 %v454_v0  ;;  %211 = vmatprep.subr.mxu1 %v190_v10  ;;  %v183_v21 = vld [vmem:[#allocation8 + $0xa0] sm:$0xff]  ;;  %v182_v22 = vld [vmem:[#allocation8 + $0x98] sm:$0xff]  ;;  %v71_v23 = vld [vmem:[#allocation6 + $0x30] sm:$0xff] }
  0x2e   :  { %323 = vmatpush3.msra.mxu0 %v77_v4  ;;  %212 = vmatpush1.msra.mxu1 %v189_v12  ;;  %v181_v24 = vld [vmem:[#allocation8 + $0x90] sm:$0xff]  ;;  %v180_v25 = vld [vmem:[#allocation8 + $0x88] sm:$0xff]  ;;  %v179_v27 = vld [vmem:[#allocation8 + $0x80] sm:$0xff] }
  0x2f   :  { %324 = vmatprep.subr.mxu0 %v454_v0  ;;  %213 = vmatprep.subr.mxu1 %v188_v13  ;;  %v70_v26 = vld [vmem:[#allocation6 + $0x28] sm:$0xff]  ;;  %v178_v28 = vld [vmem:[#allocation8 + $0x78] sm:$0xff]  ;;  %v69_v29 = vld [vmem:[#allocation6 + $0x20] sm:$0xff] }
  0x30   :  { %325 = vmatpush3.msra.mxu0 %v76_v5  ;;  %214 = vmatpush1.msra.mxu1 %v187_v15  ;;  %v177_v30 = vld [vmem:[#allocation8 + $0x70] sm:$0xff]  ;;  %v176_v31 = vld [vmem:[#allocation8 + $0x68] sm:$0xff]  ;;  %v68_v32 = vld [vmem:[#allocation6 + $0x18] sm:$0xff] }
  0x31   :  { %326 = vmatprep.subr.mxu0 %v454_v0  ;;  %215 = vmatprep.subr.mxu1 %v186_v16  ;;  %v175_v33 = vld [vmem:[#allocation8 + $0x60] sm:$0xff]  ;;  %v174_v34 = vld [vmem:[#allocation8 + $0x58] sm:$0xff]  ;;  %v67_v35 = vld [vmem:[#allocation6 + $0x10] sm:$0xff] }
  0x32   :  { %327 = vmatpush3.msra.mxu0 %v75_v11  ;;  %216 = vmatpush1.msra.mxu1 %v185_v18  ;;  %v173_v36 = vld [vmem:[#allocation8 + $0x50] sm:$0xff]  ;;  %v172_v37 = vld [vmem:[#allocation8 + $0x48] sm:$0xff]  ;;  %v171_v39 = vld [vmem:[#allocation8 + $0x40] sm:$0xff] }
  0x33   :  { %328 = vmatprep.subr.mxu0 %v454_v0  ;;  %217 = vmatprep.subr.mxu1 %v184_v19  ;;  %v66_v38 = vld [vmem:[#allocation6 + $0x8] sm:$0xff]  ;;  %v170_v40 = vld [vmem:[#allocation8 + $0x38] sm:$0xff]  ;;  %v65_v41 = vld [vmem:[#allocation6] sm:$0xff] }
  0x34   :  { %329 = vmatpush3.msra.mxu0 %v74_v14  ;;  %218 = vmatpush1.msra.mxu1 %v183_v21  ;;  %v169_v42 = vld [vmem:[#allocation8 + $0x30] sm:$0xff]  ;;  %v64_v43 = vld [vmem:[#allocation3] sm:$0xff]  ;;  %v168_v44 = vld [vmem:[#allocation8 + $0x28] sm:$0xff] }
  0x35   :  { %330 = vmatprep.subr.mxu0 %v454_v0  ;;  %219 = vmatprep.subr.mxu1 %v182_v22  ;;  %v167_v45 = vld [vmem:[#allocation8 + $0x20] sm:$0xff]  ;;  %v166_v46 = vld [vmem:[#allocation8 + $0x18] sm:$0xff]  ;;  %v165_v47 = vld [vmem:[#allocation8 + $0x10] sm:$0xff] }
  0x36   :  { %331 = vmatpush3.msra.mxu0 %v73_v17  ;;  %220 = vmatpush1.msra.mxu1 %v181_v24  ;;  %v164_v48 = vld [vmem:[#allocation8 + $0x8] sm:$0xff]  ;;  %v163_v49 = vld [vmem:[#allocation8] sm:$0xff]  ;;  %v298_v50 = vld [vmem:[%s525_s2] ss:$0 sm:$0xff]  ;;  %s456_s2 = smov [#allocation9]  }
  0x37   :  { %332 = vmatprep.subr.mxu0 %v454_v0  ;;  %221 = vmatprep.subr.mxu1 %v180_v25  ;;  %v195_v59 = vld [vmem:[%s527_s4] sm:$0x3]  ;;  %s288_s13 = sshll.u32 %s456_s2, 4  ;;  %s289_s13 = int_to_ptr.vmem [resolvable:$true] %s288_s13 }
  0x38   :  { %333 = vmatpush3.msra.mxu0 %v72_v20  ;;  %222 = vmatpush1.msra.mxu1 %v179_v27  ;;  %v200_v61 = vrot.slane %v195_v59, %v199_v58  ;;  %v204_v62 = vrot.slane %v195_v59, %v203_v60  ;;  %s421_s14 = scalar_lea.vmem %s289_s13, 256  ;;  %p426_p2 = scmp.lt.s32.totalorder %s289_s13, %s289_s13 }
  0x39   :  { %334 = vmatprep.subr.mxu0 %v454_v0  ;;  %223 = vmatprep.subr.mxu1 %v178_v28  ;;  %p422_p1 = scmp.ne.s32.totalorder %s289_s13, %s421_s14  ;;  %p427_p3 = scmp.lt.s32.totalorder %s421_s14, %s421_s14 }
  0x3a   :  { %335 = vmatpush3.msra.mxu0 %v71_v23  ;;  %224 = vmatpush1.msra.mxu1 %v177_v30 }
  0x3b   :  { %336 = vmatprep.subr.mxu0 %v454_v0  ;;  %225 = vmatprep.subr.mxu1 %v176_v31  ;;  %p428_p4 = por %p427_p3, %p426_p2 }
  0x3c   :  { %337 = vmatpush3.msra.mxu0 %v70_v26  ;;  %226 = vmatpush1.msra.mxu1 %v175_v33 }
  0x3d   :  { %338 = vmatprep.subr.mxu0 %v454_v0  ;;  %227 = vmatprep.subr.mxu1 %v174_v34  ;;  %p429_p5 = pnand %p428_p4, %p422_p1 }
  0x3e   :  { %339 = vmatpush3.msra.mxu0 %v69_v29  ;;  %228 = vmatpush1.msra.mxu1 %v173_v36 }
  0x3f   :  { %340 = vmatprep.subr.mxu0 %v454_v0  ;;  %229 = vmatprep.subr.mxu1 %v172_v37 }
  0x40   :  { %341 = vmatpush3.msra.mxu0 %v68_v32  ;;  %230 = vmatpush1.msra.mxu1 %v171_v39 }
  0x41   :  { %342 = vmatprep.subr.mxu0 %v454_v0  ;;  %231 = vmatprep.subr.mxu1 %v170_v40 }
  0x42   :  { %343 = vmatpush3.msra.mxu0 %v67_v35  ;;  %232 = vmatpush1.msra.mxu1 %v169_v42 }
  0x43   :  { %344 = vmatprep.subr.mxu0 %v454_v0  ;;  %233 = vmatprep.subr.mxu1 %v168_v44 }
  0x44   :  { %345 = vmatpush3.msra.mxu0 %v66_v38  ;;  %234 = vmatpush1.msra.mxu1 %v167_v45 }
  0x45   :  { %346 = vmatprep.subr.mxu0 %v454_v0  ;;  %235 = vmatprep.subr.mxu1 %v166_v46 }
  0x46   :  { %347 = vmatpush3.msra.mxu0 %v65_v41  ;;  %236 = vmatpush1.msra.mxu1 %v165_v47 }
  0x47   :  { %349 = vmatmul.mubr.f32.vlgmr.msra.gmra.mxu0 %v64_v43  ;;  %237 = vmatprep.subr.mxu1 %v164_v48 }
  0x48   :  { %238 = vmatpush1.msra.mxu1 %v163_v49 }
 0x107   :  { %v154_v51 = vpop.f32.mrf.mxu0 }
 0x108   :  { %v155_v52 = vadd.f32 %v298_v50, %v154_v51 }
 0x109   :  { %v350_v53 = vpop.f32.mrf.mxu0 }
 0x10a   :  { %v159_v54 = vmul.f32 0.2, %v155_v52  ;;  %vm158_vm1 = vcmp.ge.f32.partialorder %v155_v52, 0.0 }
 0x10c   :  { %v160_v55 = vsel %vm158_vm1, %v155_v52, %v159_v54 }
 0x10d   :  { %272 = vmatmul.mubr.f32.vlgmr.msra.gmra.mxu1 %v160_v55 }
 0x1cd   :  { %v273_v63 = vpop.f32.mrf.mxu1 }
 0x1ce   :  { %v274_v0 = vadd.f32 %v273_v63, %v200_v61 }
 0x1cf   :  { %v275_v1 = vpop.f32.mrf.mxu1 }
 0x1d0   :  { %v278_v2 = vmax.f32 %v274_v0, 0.0  ;;  %v276_v3 = vadd.f32 %v275_v1, %v204_v62 }
 0x1d2   :  { %280 = vst [vmem:[#allocation9] sm:$0xff] %v278_v2  ;;  %v279_v4 = vmax.f32 %v276_v3, 0.0 }
 0x1d4   :  { %281 = vst [vmem:[#allocation9 + $0x8] sm:$0xff] %v279_v4 }
 0x1d5   :  { %432 = shalt.err (!%p429_p5)
}
 0x1d6   :  { %291 = dma.vmem_to_hbm [thread:$0]  %s289_s13, 256, %s528_s5, [#allocation5]  }
 0x1d7   :  { %445 = dma.done.wait [#allocation5], 256  }
 0x1d8   :  { %446 = vsyncadd [#allocation5], 4294967040 }
 0x1d9   :  { %295 = vsyncpa [#allocation4], 1 }
 0x1da   :  { %296 = vsyncpa [#allocation7], 1 }
 0x1db   :  { %297 = vsyncpa [#allocation5], 1 }

</bundles_post_ra>
